<compile_context>
chip_gen: v7x
topology: tpu7x:2x2x1
jax: 0.10.0
libtpu: 0.0.40
codegen_flags: <defaults>
</compile_context>

<pallas_src>
import functools

import jax
import jax.numpy as jnp
from jax.experimental import pallas as pl
from jax.experimental.pallas import tpu as pltpu

_LANE = 128
_MAX_TILE_SUB = 256   # sub-rows per grid step -> 256*128 = 32768 rows/step (~3.2 MiB VMEM live)


def _ce_kernel(p_ref, l_ref, out_ref, acc_ref, *, inv_n):
    """One row-tile of the weighted 3-way cross-entropy.

    p_ref   : (3 classes, 3 groups, tile_sub, 128) pred block (native dtype).
    l_ref   : (3 classes, 3 groups, tile_sub, 128) one-hot label block (int8).
    out_ref : (3,) f32 in SMEM -> [total, spinal, neural] (written at last tile).
    acc_ref : (3 groups, tile_sub, 128) f32 VMEM scratch of running weighted-CE partials.
    """
    t = pl.program_id(0)

    @pl.when(t == 0)
    def _init():
        acc_ref[...] = jnp.zeros_like(acc_ref)

    p0 = p_ref[0].astype(jnp.float32)   # (3 groups, tile_sub, 128), sublane/lane dense
    p1 = p_ref[1].astype(jnp.float32)
    p2 = p_ref[2].astype(jnp.float32)
    l0 = l_ref[0].astype(jnp.float32)
    l1 = l_ref[1].astype(jnp.float32)
    l2 = l_ref[2].astype(jnp.float32)

    # Stable 3-class logsumexp with only two exponentials (exp of the max is 1).
    lo01 = jnp.minimum(p0, p1)
    hi01 = jnp.maximum(p0, p1)
    m = jnp.maximum(hi01, p2)
    mid = jnp.minimum(hi01, p2)
    lse = m + jnp.log(1.0 + jnp.exp(lo01 - m) + jnp.exp(mid - m))

    # Soft-label CE: lse - sum_c label_c * pred_c ; weight 2**argmax(one-hot).
    ce = lse - (l0 * p0 + l1 * p1 + l2 * p2)
    w = l0 + 2.0 * (l1 + 2.0 * l2)

    # Dense per-element accumulation: pure VALU adds, no per-tile cross-lane reduce,
    # no lane-sparse stores.  Padded rows have w == 0 and contribute nothing.
    acc_ref[...] += ce * w

    @pl.when(t == pl.num_programs(0) - 1)
    def _finalize():
        s0 = jnp.sum(acc_ref[0])                         # single XLU reduce per group,
        s1 = jnp.sum(acc_ref[1])                         # done once at the very end
        s2 = jnp.sum(acc_ref[2])
        out_ref[0] = (s0 + s1 + s2) * (inv_n / 3.0)      # total  = mean of group means
        out_ref[1] = s0 * inv_n                          # spinal = group-0 mean
        out_ref[2] = (s1 + s2) * (0.5 * inv_n)           # neural = mean of groups 1,2


def custom_loss(pred, label):
    """JAX/Pallas equivalent of CustomLoss.forward.

    pred:  [B, 45] logits
    label: dict {'label': [B, 45]} one-hot labels (or the array directly)
    returns (total_loss, {'spinal_loss': ..., 'neural_loss': ...})
    """
    if isinstance(label, dict):
        label = label['label']

    B = pred.shape[0]
    N = B * 5  # rows per group (batch * 5 levels)

    def to_planes(x):
        # [B, 45] -> [B, 3 groups, 5 levels, 3 classes] -> [class, group, B*5]
        return jnp.transpose(x.reshape(B, 3, 5, 3), (3, 1, 0, 2)).reshape(3, 3, N)

    # Row-axis tiling: rows are folded to (sub, 128).  tile_sub is a multiple of 8 (f32
    # sublane tile); when the grid has >1 step tile_sub == 256, which is also int8-safe.
    sub_needed = -(-N // _LANE)
    tile_sub = min(_MAX_TILE_SUB, -(-sub_needed // 8) * 8)
    sub_pad = -(-sub_needed // tile_sub) * tile_sub
    n_pad = sub_pad * _LANE

    p = to_planes(pred)                              # native dtype; upcast happens in-kernel
    l = to_planes(label.astype(jnp.int8))            # one-hot 0/1 -> exact in int8, 4x less HBM

    if n_pad != N:
        pad = ((0, 0), (0, 0), (0, n_pad - N))       # padded rows: label 0 -> weight 0 -> exact
        p = jnp.pad(p, pad)
        l = jnp.pad(l, pad)

    p = p.reshape(3, 3, sub_pad, _LANE)
    l = l.reshape(3, 3, sub_pad, _LANE)

    out = pl.pallas_call(
        functools.partial(_ce_kernel, inv_n=1.0 / N),
        out_shape=jax.ShapeDtypeStruct((3,), jnp.float32),
        grid=(sub_pad // tile_sub,),
        in_specs=[pl.BlockSpec((3, 3, tile_sub, _LANE), lambda t: (0, 0, t, 0)),
                  pl.BlockSpec((3, 3, tile_sub, _LANE), lambda t: (0, 0, t, 0))],
        out_specs=pl.BlockSpec(memory_space=pltpu.MemorySpace.SMEM),
        scratch_shapes=[pltpu.VMEM((3, tile_sub, _LANE), jnp.float32)],
        compiler_params=pltpu.CompilerParams(
            dimension_semantics=("arbitrary",)),
    )(p, l)

    return out[0], {'spinal_loss': out[1], 'neural_loss': out[2]}


def _reference_loss(pred, label):
    """Pure-JAX reference mirroring the PyTorch semantics exactly."""
    losses = []
    for i in range(3):
        p = pred[:, 15 * i:15 * (i + 1)].reshape(-1, 3)
        l = label[:, 15 * i:15 * (i + 1)].reshape(-1, 3)
        w = 2.0 ** jnp.argmax(l, axis=-1).astype(jnp.float32)
        logsm = p - jax.scipy.special.logsumexp(p, axis=-1, keepdims=True)
        ce = -jnp.sum(l * logsm, axis=-1)
        losses.append(jnp.mean(ce * w))
    total = sum(losses) / 3.0
    return total, losses


if __name__ == "__main__":
    key = jax.random.PRNGKey(0)
    k_pred, k_lab = jax.random.split(key)

    B = 8
    pred = jax.random.normal(k_pred, (B, 45), dtype=jnp.float32)
    class_idx = jax.random.randint(k_lab, (B, 15), 0, 3)
    label = jax.nn.one_hot(class_idx, 3, dtype=jnp.float32).reshape(B, 45)

    total, parts = custom_loss(pred, {'label': label})
    total = jax.block_until_ready(total)
    parts = jax.tree_util.tree_map(jax.block_until_ready, parts)

    # sanity check against pure-JAX reference
    ref_total, ref_losses = _reference_loss(pred, label)
    assert jnp.allclose(total, ref_total, atol=1e-5, rtol=1e-5)
    assert jnp.allclose(parts['spinal_loss'], ref_losses[0], atol=1e-5, rtol=1e-5)
    assert jnp.allclose(parts['neural_loss'], (ref_losses[1] + ref_losses[2]) / 2.0,
                        atol=1e-5, rtol=1e-5)

    print("KERNEL_OK")
</pallas_src>

<mosaic_0001>
module attributes {stable_mosaic.version = 11 : i64} {
  func.func @_ce_kernel(%arg0: i32, %arg1: memref<3x3x8x128xf32, #tpu.memory_space<vmem>>, %arg2: memref<3x3x8x128xi8, #tpu.memory_space<vmem>>, %arg3: memref<3xf32, #tpu.memory_space<smem>>, %arg4: memref<3x8x128xf32, #tpu.memory_space<vmem>>) attributes {dimension_semantics = [#tpu.dimension_semantics<arbitrary>], iteration_bounds = array<i64: 1>, scalar_prefetch = 0 : i64, scratch_operands = 1 : i64, tpu.core_type = #tpu.core_type<tc>, window_params = [{transform_indices = @transform_0, window_bounds = array<i64: 3, 3, 8, 128>}, {transform_indices = @transform_1, window_bounds = array<i64: 3, 3, 8, 128>}, {transform_indices = @transform_2, window_bounds = array<i64: 3>}]} {
    %c0_i32 = arith.constant 0 : i32
    %0 = arith.cmpi eq, %arg0, %c0_i32 : i32
    %1 = arith.extui %0 : i1 to i32
    %c0_i32_0 = arith.constant 0 : i32
    %2 = arith.cmpi ne, %1, %c0_i32_0 : i32
    scf.if %2 {
      %cst_32 = arith.constant 0.000000e+00 : f32
      %50 = vector.broadcast %cst_32 : f32 to vector<3x8x128xf32>
      %c0_33 = arith.constant 0 : index
      %c0_34 = arith.constant 0 : index
      %c0_35 = arith.constant 0 : index
      %51 = vector.load %arg4[%c0_33, %c0_34, %c0_35] : memref<3x8x128xf32, #tpu.memory_space<vmem>>, vector<3x8x128xf32>
      tpu.vector_store %arg4[%c0_33, %c0_34, %c0_35], %50 {strides = array<i32>} : memref<3x8x128xf32, #tpu.memory_space<vmem>>, vector<3x8x128xf32>,
    } else {
    }
    %c0 = arith.constant 0 : index
    %c0_1 = arith.constant 0 : index
    %c0_2 = arith.constant 0 : index
    %c0_3 = arith.constant 0 : index
    %3 = vector.load %arg1[%c0, %c0_1, %c0_2, %c0_3] : memref<3x3x8x128xf32, #tpu.memory_space<vmem>>, vector<1x3x8x128xf32>
    %4 = vector.shape_cast %3 : vector<1x3x8x128xf32> to vector<3x8x128xf32>
    %c1 = arith.constant 1 : index
    %c0_4 = arith.constant 0 : index
    %c0_5 = arith.constant 0 : index
    %c0_6 = arith.constant 0 : index
    %5 = vector.load %arg1[%c1, %c0_4, %c0_5, %c0_6] : memref<3x3x8x128xf32, #tpu.memory_space<vmem>>, vector<1x3x8x128xf32>
    %6 = vector.shape_cast %5 : vector<1x3x8x128xf32> to vector<3x8x128xf32>
    %c2 = arith.constant 2 : index
    %c0_7 = arith.constant 0 : index
    %c0_8 = arith.constant 0 : index
    %c0_9 = arith.constant 0 : index
    %7 = vector.load %arg1[%c2, %c0_7, %c0_8, %c0_9] : memref<3x3x8x128xf32, #tpu.memory_space<vmem>>, vector<1x3x8x128xf32>
    %8 = vector.shape_cast %7 : vector<1x3x8x128xf32> to vector<3x8x128xf32>
    %c0_10 = arith.constant 0 : index
    %c0_11 = arith.constant 0 : index
    %c0_12 = arith.constant 0 : index
    %c0_13 = arith.constant 0 : index
    %9 = vector.load %arg2[%c0_10, %c0_11, %c0_12, %c0_13] : memref<3x3x8x128xi8, #tpu.memory_space<vmem>>, vector<1x3x8x128xi8>
    %10 = vector.shape_cast %9 : vector<1x3x8x128xi8> to vector<3x8x128xi8>
    %11 = arith.sitofp %10 : vector<3x8x128xi8> to vector<3x8x128xf32>
    %c1_14 = arith.constant 1 : index
    %c0_15 = arith.constant 0 : index
    %c0_16 = arith.constant 0 : index
    %c0_17 = arith.constant 0 : index
    %12 = vector.load %arg2[%c1_14, %c0_15, %c0_16, %c0_17] : memref<3x3x8x128xi8, #tpu.memory_space<vmem>>, vector<1x3x8x128xi8>
    %13 = vector.shape_cast %12 : vector<1x3x8x128xi8> to vector<3x8x128xi8>
    %14 = arith.sitofp %13 : vector<3x8x128xi8> to vector<3x8x128xf32>
    %c2_18 = arith.constant 2 : index
    %c0_19 = arith.constant 0 : index
    %c0_20 = arith.constant 0 : index
    %c0_21 = arith.constant 0 : index
    %15 = vector.load %arg2[%c2_18, %c0_19, %c0_20, %c0_21] : memref<3x3x8x128xi8, #tpu.memory_space<vmem>>, vector<1x3x8x128xi8>
    %16 = vector.shape_cast %15 : vector<1x3x8x128xi8> to vector<3x8x128xi8>
    %17 = arith.sitofp %16 : vector<3x8x128xi8> to vector<3x8x128xf32>
    %18 = arith.minimumf %4, %6 : vector<3x8x128xf32>
    %19 = arith.maximumf %4, %6 : vector<3x8x128xf32>
    %20 = arith.maximumf %19, %8 : vector<3x8x128xf32>
    %21 = arith.minimumf %19, %8 : vector<3x8x128xf32>
    %22 = arith.subf %18, %20 : vector<3x8x128xf32>
    %23 = math.exp %22 : vector<3x8x128xf32>
    %cst = arith.constant 1.000000e+00 : f32
    %24 = vector.broadcast %cst : f32 to vector<3x8x128xf32>
    %25 = arith.addf %24, %23 : vector<3x8x128xf32>
    %26 = arith.subf %21, %20 : vector<3x8x128xf32>
    %27 = math.exp %26 : vector<3x8x128xf32>
    %28 = arith.addf %25, %27 : vector<3x8x128xf32>
    %29 = math.log %28 : vector<3x8x128xf32>
    %30 = arith.addf %20, %29 : vector<3x8x128xf32>
    %31 = arith.mulf %11, %4 : vector<3x8x128xf32>
    %32 = arith.mulf %14, %6 : vector<3x8x128xf32>
    %33 = arith.addf %31, %32 : vector<3x8x128xf32>
    %34 = arith.mulf %17, %8 : vector<3x8x128xf32>
    %35 = arith.addf %33, %34 : vector<3x8x128xf32>
    %36 = arith.subf %30, %35 : vector<3x8x128xf32>
    %cst_22 = arith.constant 2.000000e+00 : f32
    %37 = vector.broadcast %cst_22 : f32 to vector<3x8x128xf32>
    %38 = arith.mulf %37, %17 : vector<3x8x128xf32>
    %39 = arith.addf %14, %38 : vector<3x8x128xf32>
    %cst_23 = arith.constant 2.000000e+00 : f32
    %40 = vector.broadcast %cst_23 : f32 to vector<3x8x128xf32>
    %41 = arith.mulf %40, %39 : vector<3x8x128xf32>
    %42 = arith.addf %11, %41 : vector<3x8x128xf32>
    %c0_24 = arith.constant 0 : index
    %c0_25 = arith.constant 0 : index
    %c0_26 = arith.constant 0 : index
    %43 = vector.load %arg4[%c0_24, %c0_25, %c0_26] : memref<3x8x128xf32, #tpu.memory_space<vmem>>, vector<3x8x128xf32>
    %44 = arith.mulf %36, %42 : vector<3x8x128xf32>
    %45 = arith.addf %43, %44 : vector<3x8x128xf32>
    %c0_27 = arith.constant 0 : index
    %c0_28 = arith.constant 0 : index
    %c0_29 = arith.constant 0 : index
    %46 = vector.load %arg4[%c0_27, %c0_28, %c0_29] : memref<3x8x128xf32, #tpu.memory_space<vmem>>, vector<3x8x128xf32>
    tpu.vector_store %arg4[%c0_27, %c0_28, %c0_29], %45 {strides = array<i32>} : memref<3x8x128xf32, #tpu.memory_space<vmem>>, vector<3x8x128xf32>,
    %c0_i32_30 = arith.constant 0 : i32
    %47 = arith.cmpi eq, %arg0, %c0_i32_30 : i32
    %48 = arith.extui %47 : i1 to i32
    %c0_i32_31 = arith.constant 0 : i32
    %49 = arith.cmpi ne, %48, %c0_i32_31 : i32
    scf.if %49 {
      %c0_32 = arith.constant 0 : index
      %c0_33 = arith.constant 0 : index
      %c0_34 = arith.constant 0 : index
      %50 = vector.load %arg4[%c0_32, %c0_33, %c0_34] : memref<3x8x128xf32, #tpu.memory_space<vmem>>, vector<1x8x128xf32>
      %51 = vector.shape_cast %50 : vector<1x8x128xf32> to vector<8x128xf32>
      %52 = vector.shape_cast %51 : vector<8x128xf32> to vector<1x8x128xf32>
      %cst_35 = arith.constant dense<0.000000e+00> : vector<1xf32>
      %53 = vector.multi_reduction <add>, %52, %cst_35 [1, 2] : vector<1x8x128xf32> to vector<1xf32>
      %54 = vector.shape_cast %53 : vector<1xf32> to vector<1x1x1xf32>
      %55 = vector.extract %54[0, 0, 0] : f32 from vector<1x1x1xf32>
      %c1_36 = arith.constant 1 : index
      %c0_37 = arith.constant 0 : index
      %c0_38 = arith.constant 0 : index
      %56 = vector.load %arg4[%c1_36, %c0_37, %c0_38] : memref<3x8x128xf32, #tpu.memory_space<vmem>>, vector<1x8x128xf32>
      %57 = vector.shape_cast %56 : vector<1x8x128xf32> to vector<8x128xf32>
      %58 = vector.shape_cast %57 : vector<8x128xf32> to vector<1x8x128xf32>
      %cst_39 = arith.constant dense<0.000000e+00> : vector<1xf32>
      %59 = vector.multi_reduction <add>, %58, %cst_39 [1, 2] : vector<1x8x128xf32> to vector<1xf32>
      %60 = vector.shape_cast %59 : vector<1xf32> to vector<1x1x1xf32>
      %61 = vector.extract %60[0, 0, 0] : f32 from vector<1x1x1xf32>
      %c2_40 = arith.constant 2 : index
      %c0_41 = arith.constant 0 : index
      %c0_42 = arith.constant 0 : index
      %62 = vector.load %arg4[%c2_40, %c0_41, %c0_42] : memref<3x8x128xf32, #tpu.memory_space<vmem>>, vector<1x8x128xf32>
      %63 = vector.shape_cast %62 : vector<1x8x128xf32> to vector<8x128xf32>
      %64 = vector.shape_cast %63 : vector<8x128xf32> to vector<1x8x128xf32>
      %cst_43 = arith.constant dense<0.000000e+00> : vector<1xf32>
      %65 = vector.multi_reduction <add>, %64, %cst_43 [1, 2] : vector<1x8x128xf32> to vector<1xf32>
      %66 = vector.shape_cast %65 : vector<1xf32> to vector<1x1x1xf32>
      %67 = vector.extract %66[0, 0, 0] : f32 from vector<1x1x1xf32>
      %68 = arith.addf %55, %61 : f32
      %69 = arith.addf %68, %67 : f32
      %cst_44 = arith.constant 0.00833333377 : f32
      %70 = arith.mulf %69, %cst_44 : f32
      %c0_45 = arith.constant 0 : index
      %71 = memref.load %arg3[%c0_45] : memref<3xf32, #tpu.memory_space<smem>>
      memref.store %70, %arg3[%c0_45] : memref<3xf32, #tpu.memory_space<smem>>
      %cst_46 = arith.constant 2.500000e-02 : f32
      %72 = arith.mulf %55, %cst_46 : f32
      %c1_47 = arith.constant 1 : index
      %73 = memref.load %arg3[%c1_47] : memref<3xf32, #tpu.memory_space<smem>>
      memref.store %72, %arg3[%c1_47] : memref<3xf32, #tpu.memory_space<smem>>
      %74 = arith.addf %61, %67 : f32
      %cst_48 = arith.constant 1.250000e-02 : f32
      %75 = arith.mulf %74, %cst_48 : f32
      %c2_49 = arith.constant 2 : index
      %76 = memref.load %arg3[%c2_49] : memref<3xf32, #tpu.memory_space<smem>>
      memref.store %75, %arg3[%c2_49] : memref<3xf32, #tpu.memory_space<smem>>
    } else {
    }
    return
  }
  func.func @transform_0(%arg0: i32) -> (i32, i32, i32, i32) {
    %c0_i32 = arith.constant 0 : i32
    %c0_i32_0 = arith.constant 0 : i32
    %c0_i32_1 = arith.constant 0 : i32
    %c0_i32_2 = arith.constant 0 : i32
    return %c0_i32, %c0_i32_0, %arg0, %c0_i32_1 : i32, i32, i32, i32
  }
  func.func @transform_1(%arg0: i32) -> (i32, i32, i32, i32) {
    %c0_i32 = arith.constant 0 : i32
    %c0_i32_0 = arith.constant 0 : i32
    %c0_i32_1 = arith.constant 0 : i32
    %c0_i32_2 = arith.constant 0 : i32
    return %c0_i32, %c0_i32_0, %arg0, %c0_i32_1 : i32, i32, i32, i32
  }
  func.func @transform_2(%arg0: i32) -> i32 {
    %c0_i32 = arith.constant 0 : i32
    %c0_i32_0 = arith.constant 0 : i32
    return %c0_i32 : i32
  }
}

</mosaic_0001>

<bundles_post_ra>
// kernel: tpu_custom_call.1
= control target key start
LH: loop header
LB: loop body
LE: loop exit
PB: predicated region body
PF: predicated region fallthrough
CT: control target
= control target key end

     0   :  { %7 = vsyncpa [#allocation4], 0  ;;  %s453_s0 = inlined_call_operand.hbm [shape: f32[3,3,8,128], index: 0, kind: input, shape index: {}]   ;;  %s454_s1 = inlined_call_operand.hbm [shape: s8[3,3,8,128], index: 1, kind: input, shape index: {}]   ;;  %s455_s2 = inlined_call_operand.hbm [shape: f32[3], index: 2, kind: output, shape index: {}]  }
   0x1   :  { %8 = vsyncpa [#allocation7], 0 }
   0x2   :  { %9 = vsyncpa [#allocation5], 0  ;;  %s345_s9 = smov [#allocation3]   ;;  %s285_s13 = scalar_lea.hbm %s453_s0, 1152 }
   0x3   :  { %s15_s10 = sshll.u32 %s345_s9, 4  ;;  %p286_p0 = scmp.ne.s32.totalorder %s453_s0, %s285_s13  ;;  %s16_s10 = int_to_ptr.vmem [resolvable:$true] %s15_s10 }
   0x4   :  { %p289_p1 = scmp.lt.u32.totalorder %s285_s13, %s453_s0 }
   0x6   :  { %p291_p2 = pnand %p289_p1, %p286_p0 }
   0x8   :  { %294 = shalt.err (!%p291_p2)
}
   0x9   :  { %s295_s18 = scalar_lea.vmem %s16_s10, 1152  ;;  %p300_p4 = scmp.lt.s32.totalorder %s16_s10, %s16_s10 }
   0xa   :  { %p296_p3 = scmp.ne.s32.totalorder %s16_s10, %s295_s18  ;;  %p301_p5 = scmp.lt.s32.totalorder %s295_s18, %s295_s18 }
   0xc   :  { %p302_p6 = por %p301_p5, %p300_p4 }
   0xe   :  { %p303_p7 = pnand %p302_p6, %p296_p3 }
  0x10   :  { %306 = shalt.err (!%p303_p7)
}
  0x11   :  { %s346_s19 = smov 128   ;;  %s347_s20 = smov 8  }
  0x12   :  { %21 = dma.hbm_to_vmem [thread:$0]  %s453_s0, 1152, %s16_s10, [#allocation4], %s346_s19, %s346_s19, %s347_s20  }
  0x13   :  { %s348_s23 = smov [#allocation6]   ;;  %s307_s27 = scalar_lea.hbm %s454_s1, 288 }
  0x14   :  { %s27_s24 = sshll.u32 %s348_s23, 4  ;;  %p308_p8 = scmp.ne.s32.totalorder %s454_s1, %s307_s27  ;;  %s28_s24 = int_to_ptr.vmem [resolvable:$true] %s27_s24 }
  0x15   :  { %p311_p9 = scmp.lt.u32.totalorder %s307_s27, %s454_s1 }
  0x17   :  { %p313_p10 = pnand %p311_p9, %p308_p8 }
  0x19   :  { %316 = shalt.err (!%p313_p10)
}
  0x1a   :  { %s317_s4 = scalar_lea.vmem %s28_s24, 288  ;;  %p322_p12 = scmp.lt.s32.totalorder %s28_s24, %s28_s24 }
  0x1b   :  { %p318_p11 = scmp.ne.s32.totalorder %s28_s24, %s317_s4  ;;  %p323_p13 = scmp.lt.s32.totalorder %s317_s4, %s317_s4 }
  0x1d   :  { %p324_p0 = por %p323_p13, %p322_p12 }
  0x1f   :  { %p325_p1 = pnand %p324_p0, %p318_p11 }
  0x21   :  { %328 = shalt.err (!%p325_p1)
}
  0x22   :  { %s349_s0 = smov 32   ;;  %s350_s5 = smov 2  }
  0x23   :  { %33 = dma.hbm_to_vmem [thread:$0]  %s454_s1, 288, %s28_s24, [#allocation7], %s349_s0, %s349_s0, %s350_s5  }
  0x24   :  { %339 = dma.done.wait [#allocation4], 1152  }
  0x25   :  { %340 = vsyncadd [#allocation4], 4294966144 }
  0x26   :  { %341 = dma.done.wait [#allocation7], 288  }
  0x27   :  { %342 = vsyncadd [#allocation7], 4294967008  ;;  %v49_v0 = vld [vmem:[#allocation3 + $0x10] sm:$0xff]  ;;  %v53_v1 = vld [vmem:[#allocation3 + $0x28] sm:$0xff]  ;;  %s329_s18 = scalar_lea.hbm %s455_s2, 16 }
  0x28   :  { %v391_v2 = vld [vmem:[#allocation3 + $0x40] sm:$0xff]  ;;  %v89_v3 = vmin.f32 %v49_v0, %v53_v1  ;;  %v92_v4 = vmax.f32 %v49_v0, %v53_v1  ;;  %v399_v8 = vld [vmem:[#allocation3 + $0x18] sm:$0xff]  ;;  %v403_v11 = vld [vmem:[#allocation3 + $0x30] sm:$0xff]  ;;  %p330_p2 = scmp.ne.s32.totalorder %s455_s2, %s329_s18  ;;  %p333_p3 = scmp.lt.u32.totalorder %s329_s18, %s455_s2 }
  0x29   :  { %v397_v7 = vld [vmem:[#allocation3] sm:$0xff]  ;;  %v415_v20 = vld [vmem:[#allocation3 + $0x8] sm:$0xff]  ;;  %v419_v24 = vld [vmem:[#allocation3 + $0x38] sm:$0xff] }
  0x2a   :  { %v394_v5 = vmax.f32 %v92_v4, %v391_v2  ;;  %v98_v6 = vmin.f32 %v92_v4, %v391_v2  ;;  %v87_v14 = vmin.f32 %v397_v7, %v399_v8  ;;  %v90_v15 = vmax.f32 %v397_v7, %v399_v8  ;;  %v417_v21 = vld [vmem:[#allocation3 + $0x20] sm:$0xff]  ;;  %v80_v25 = vld [vmem:[#allocation6 + $0x10] sm:$0x3]  ;;  %v252_v28 = vld [vmem:[#allocation6 + $0x4] sm:$0xff]   ;;  %p335_p4 = pnand %p333_p3, %p330_p2 }
  0x2b   :  { %v88_v26 = vmin.f32 %v415_v20, %v417_v21  ;;  %v91_v27 = vmax.f32 %v415_v20, %v417_v21  ;;  %v83_v31 = vunpack.c.0.s8 %v80_v25  ;;  %v242_v35 = vunpack.c.0.s8 %v252_v28  ;;  %v237_v37 = vld [vmem:[#allocation6] ss:$12 sps:$4 sm:$0xff]  }
  0x2c   :  { %v101_v9 = vsub.f32 %v89_v3, %v394_v5  ;;  %v113_v10 = vsub.f32 %v98_v6, %v394_v5  ;;  %v410_v16 = vmax.f32 %v90_v15, %v403_v11  ;;  %v96_v17 = vmin.f32 %v90_v15, %v403_v11 }
  0x2d   :  { %v426_v29 = vmax.f32 %v91_v27, %v419_v24  ;;  %v97_v30 = vmin.f32 %v91_v27, %v419_v24  ;;  %v247_v36 = vunpack.c.3.s8 %v252_v28  ;;  %v86_v42 = vcvt.s32.f32 %v83_v31 }
  0x2e   :  { %v106_v12 = vmul.f32 1.442695, %v101_v9  ;;  %v118_v13 = vmul.f32 1.442695, %v113_v10  ;;  %v99_v18 = vsub.f32 %v87_v14, %v410_v16  ;;  %v111_v19 = vsub.f32 %v96_v17, %v410_v16 }
  0x2f   :  { %v100_v32 = vsub.f32 %v88_v26, %v426_v29  ;;  %v112_v33 = vsub.f32 %v97_v30, %v426_v29  ;;  %v66_v44 = vcvt.s32.f32 %v242_v35  ;;  %v76_v45 = vcvt.s32.f32 %v247_v36 }
  0x30   :  { %267 = vpow2.f32 %v106_v12  ;;  %v102_v22 = vmul.f32 1.442695, %v99_v18  ;;  %v114_v23 = vmul.f32 1.442695, %v111_v19  ;;  %v250_v46 = vunpack.c.2.s8 %v237_v37 }
  0x31   :  { %269 = vpow2.f32 %v118_v13  ;;  %v104_v40 = vmul.f32 1.442695, %v100_v32  ;;  %v116_v41 = vmul.f32 1.442695, %v112_v33  ;;  %v243_v48 = vunpack.c.1.s8 %v252_v28 }
  0x32   :  { %271 = vpow2.f32 %v102_v22  ;;  %v152_v49 = vmul.f32 2.0, %v86_v42  ;;  %v238_v50 = vunpack.c.0.s8 %v237_v37  ;;  %v134_v53 = vmul.f32 %v66_v44, %v49_v0 }
  0x33   :  { %273 = vpow2.f32 %v114_v23  ;;  %v137_v54 = vmul.f32 %v76_v45, %v53_v1  ;;  %v84_v55 = vcvt.s32.f32 %v250_v46  ;;  %v74_v59 = vcvt.s32.f32 %v243_v48 }
  0x34   :  { %275 = vpow2.f32 %v104_v40  ;;  %v155_v57 = vadd.f32 %v152_v49, %v76_v45  ;;  %v64_v58 = vcvt.s32.f32 %v238_v50  ;;  %v251_v60 = vunpack.c.3.s8 %v237_v37 }
  0x35   :  { %277 = vpow2.f32 %v116_v41  ;;  %v140_v61 = vadd.f32 %v137_v54, %v134_v53  ;;  %v143_v62 = vmul.f32 %v86_v42, %v391_v2  ;;  %v150_v63 = vmul.f32 2.0, %v84_v55 }
  0x36   :  { %v239_v4 = vunpack.c.1.s8 %v237_v37  ;;  %v246_v6 = vunpack.c.2.s8 %v252_v28  ;;  %v158_v10 = vmul.f32 2.0, %v155_v57  ;;  %v132_v12 = vmul.f32 %v64_v58, %v397_v7 }
  0x37   :  { %v135_v0 = vmul.f32 %v74_v59, %v399_v8  ;;  %v85_v14 = vcvt.s32.f32 %v251_v60  ;;  %v146_v17 = vadd.f32 %v143_v62, %v140_v61  ;;  %v153_v18 = vadd.f32 %v150_v63, %v74_v59 }
  0x38   :  { %v141_v22 = vmul.f32 %v84_v55, %v403_v11  ;;  %v65_v2 = vcvt.s32.f32 %v239_v4  ;;  %v75_v23 = vcvt.s32.f32 %v246_v6  ;;  %v161_v26 = vadd.f32 %v158_v10, %v66_v44 }
  0x39   :  { %v138_v27 = vadd.f32 %v135_v0, %v132_v12  ;;  %v151_v28 = vmul.f32 2.0, %v85_v14  ;;  %v156_v30 = vmul.f32 2.0, %v153_v18 }
  0x3a   :  { %v268_v34 = vpop.eup %267  ;;  %v133_v31 = vmul.f32 %v65_v2, %v415_v20  ;;  %v136_v32 = vmul.f32 %v75_v23, %v417_v21 }
  0x3b   :  { %v270_v38 = vpop.eup %269  ;;  %v110_v39 = vadd.f32 1.0, %v268_v34  ;;  %v144_v35 = vadd.f32 %v141_v22, %v138_v27  ;;  %v154_v36 = vadd.f32 %v151_v28, %v75_v23  ;;  %v159_v37 = vadd.f32 %v156_v30, %v64_v58 }
  0x3c   :  { %v272_v47 = vpop.eup %271 }
  0x3d   :  { %v122_v43 = vadd.f32 %v270_v38, %v110_v39  ;;  %v274_v51 = vpop.eup %273  ;;  %v108_v52 = vadd.f32 1.0, %v272_v47  ;;  %v142_v38 = vmul.f32 %v85_v14, %v419_v24  ;;  %v157_v40 = vmul.f32 2.0, %v154_v36 }
  0x3e   :  { %v276_v3 = vpop.eup %275 }
  0x3f   :  { %279 = vlog2.f32 %v122_v43  ;;  %v120_v56 = vadd.f32 %v274_v51, %v108_v52  ;;  %v278_v9 = vpop.eup %277  ;;  %v109_v1 = vadd.f32 1.0, %v276_v3  ;;  %v160_v21 = vadd.f32 %v157_v40, %v65_v2 }
  0x41   :  { %281 = vlog2.f32 %v120_v56  ;;  %v121_v19 = vadd.f32 %v278_v9, %v109_v1 }
  0x43   :  { %283 = vlog2.f32 %v121_v19 }
  0x49   :  { %v280_v13 = vpop.eup %279 }
  0x4a   :  { %v128_v15 = vmul.f32 0.6931472, %v280_v13 }
  0x4b   :  { %v282_v8 = vpop.eup %281 }
  0x4c   :  { %v131_v25 = vadd.f32 %v128_v15, %v394_v5  ;;  %v124_v34 = vmul.f32 0.6931472, %v282_v8  ;;  %v139_v5 = vadd.f32 %v136_v32, %v133_v31 }
  0x4d   :  { %v284_v41 = vpop.eup %283 }
  0x4e   :  { %v149_v7 = vsub.f32 %v131_v25, %v146_v17  ;;  %v129_v11 = vadd.f32 %v124_v34, %v410_v16  ;;  %v126_v43 = vmul.f32 0.6931472, %v284_v41  ;;  %v145_v44 = vadd.f32 %v142_v38, %v139_v5 }
  0x50   :  { %v167_v33 = vmul.f32 %v161_v26, %v149_v7  ;;  %v147_v39 = vsub.f32 %v129_v11, %v144_v35  ;;  %v130_v20 = vadd.f32 %v126_v43, %v426_v29 }
  0x52   :  { %200 = vadd.xlane.f32.xlu1 %v167_v33  ;;  %v165_v42 = vmul.f32 %v159_v37, %v147_v39  ;;  %v148_v45 = vsub.f32 %v130_v20, %v145_v44 }
  0x54   :  { %178 = vadd.xlane.f32.xlu0 %v165_v42  ;;  %v166_v46 = vmul.f32 %v160_v21, %v148_v45 }
  0x58   :  { %189 = vadd.xlane.f32.xlu0 %v166_v46 }
  0xdf   :  { %v201_v47 = vpop.xlane.xlu1 %200 }
  0xe0   :  { %v202_v48 = vrot.slane %v201_v47, 4 }
  0xe1   :  { %v179_v16 = vpop.xlane.xlu0 %178 }
  0xe2   :  { %v180_v49 = vrot.slane %v179_v16, 4  ;;  %v203_v50 = vadd.f32 %v202_v48, %v201_v47 }
  0xe4   :  { %v181_v51 = vadd.f32 %v180_v49, %v179_v16  ;;  %v204_v52 = vrot.slane %v203_v50, 2 }
  0xe5   :  { %v190_v53 = vpop.xlane.xlu0 %189 }
  0xe6   :  { %v182_v24 = vrot.slane %v181_v51, 2  ;;  %v191_v55 = vrot.slane %v190_v53, 4  ;;  %v205_v58 = vadd.f32 %v204_v52, %v203_v50 }
  0xe8   :  { %v183_v54 = vadd.f32 %v182_v24, %v181_v51  ;;  %v192_v57 = vadd.f32 %v191_v55, %v190_v53  ;;  %v206_v61 = vrot.slane %v205_v58, 1 }
  0xea   :  { %v184_v56 = vrot.slane %v183_v54, 1  ;;  %v193_v29 = vrot.slane %v192_v57, 2  ;;  %v207_v3 = vadd.f32 %v206_v61, %v205_v58 }
  0xec   :  { %v185_v59 = vadd.f32 %v184_v56, %v183_v54  ;;  %v194_v60 = vadd.f32 %v193_v29, %v192_v57 }
  0xee   :  { %254 = vpush %v185_v59  ;;  %v195_v62 = vrot.slane %v194_v60, 1 }
  0xf0   :  { %v196_v63 = vadd.f32 %v195_v62, %v194_v60 }
  0xf2   :  { %256 = vpush %v196_v63 }
  0xf3   :  { %258 = vpush %v207_v3 }
 0x11f   :  { %s255_s1 = spop %254 }
 0x120   :  { %s214_s8 = smul.f32 0.025, %s255_s1 }
 0x122   :  { %216 = sst [smem:[#allocation8 + $0x1]] %s214_s8 }
 0x123   :  { %s257_s9 = spop %256 }
 0x124   :  { %s209_s10 = sadd.f32 %s257_s9, %s255_s1  ;;  %s259_s11 = spop %258 }
 0x125   :  { %s217_s12 = sadd.f32 %s259_s11, %s257_s9 }
 0x126   :  { %s210_s13 = sadd.f32 %s259_s11, %s209_s10 }
 0x127   :  { %s218_s14 = smul.f32 0.0125, %s217_s12 }
 0x128   :  { %s211_s15 = smul.f32 0.008333334, %s210_s13 }
 0x129   :  { %220 = sst [smem:[#allocation8 + $0x2]] %s218_s14 }
 0x12a   :  { %213 = sst [smem:[#allocation8]] %s211_s15 }
 0x12b   :  { %338 = shalt.err (!%p335_p4)
}
 0x12c   :  { %s351_s23 = smov [#allocation8]  }
 0x12d   :  { %228 = dma.smem_to_hbm %s351_s23, 16, %s455_s2, [#allocation5]  }
 0x12e   :  { %343 = dma.done.wait [#allocation5], 16  }
 0x12f   :  { %344 = vsyncadd [#allocation5], 4294967280 }
 0x130   :  { %232 = sfence }
 0x131   :  { %233 = vsyncpa [#allocation4], 1 }
 0x132   :  { %234 = vsyncpa [#allocation7], 1 }
 0x133   :  { %235 = vsyncpa [#allocation5], 1 }

</bundles_post_ra>
